<compile_context>
chip_gen: v7x
topology: tpu7x:2x2x1
jax: 0.10.0
libtpu: 0.0.40
codegen_flags: <defaults>
</compile_context>

<pallas_src>
import numpy as np
import jax
import jax.numpy as jnp
from jax.experimental import pallas as pl
from jax.experimental.pallas import tpu as pltpu


def _semlink_kernel(orig_l_ref, log_ref, oh_ref, out_ref):
    """One grid step == one batch example.

    log_ref: [V, C, T]  pre-gathered predicate rows, lane-dense T, C = C_srl + C_vn.
    oh_ref : [V, K, C]  signed one-hot (+1 srl col, -1 vn col), pre-masked for
                        j < semlink_l, k < v_l and idx != nul_idx.
    out_ref: [1, 1]     per-example partial loss.
    """
    i = pl.program_id(0)
    logT = log_ref[...]
    oh = oh_ref[...]

    # Label-axis gather AND (r - a) in one batched MXU matmul, lane-dense output in T.
    diff = jnp.einsum('vkc,vct->vkt', oh, logT,
                      preferred_element_type=jnp.float32,
                      precision=jax.lax.Precision.HIGHEST)

    T = logT.shape[-1]
    t_ids = jax.lax.broadcasted_iota(jnp.int32, (1, 1, T), 2)
    # where (not multiply) so -inf/NaN in padded timesteps cannot produce NaN via 0*inf.
    masked = jnp.where(t_ids < orig_l_ref[i], jnp.abs(diff), 0.0)
    out_ref[...] = jnp.sum(masked).reshape(1, 1)


def semlink_loss(log_srl, log_vn, v_label, v_l, orig_l, semlink, semlink_l):
    B, S, T, C_srl = log_srl.shape
    C_vn = log_vn.shape[3]
    C = C_srl + C_vn
    V = v_label.shape[1]
    K = semlink.shape[3]
    f32 = jnp.float32

    v_label = v_label.astype(jnp.int32)
    v_l = v_l.astype(jnp.int32)
    orig_l = orig_l.astype(jnp.int32)
    semlink = semlink.astype(jnp.int32)
    semlink_l = semlink_l.astype(jnp.int32)

    # ---- Wrapper-side pre-gather: only V predicate rows (of S) are ever touched. ----
    vlab = jnp.clip(v_label, 0, S - 1)                                   # [B, V]
    idx = vlab[:, :, None, None]
    g_srl = jnp.take_along_axis(log_srl, idx, axis=1)                    # [B, V, T, C_srl]
    g_vn = jnp.take_along_axis(log_vn, idx, axis=1)                      # [B, V, T, C_vn]
    log_cat = jnp.concatenate([g_srl, g_vn], axis=-1).astype(f32)        # [B, V, T, C]
    log_cat_t = jnp.swapaxes(log_cat, 2, 3)                              # [B, V, C, T]

    # ---- Wrapper-side signed, fully-masked one-hot: [B, V, K, C]. ----
    r_idx = semlink[:, :, 0, :]                                          # [B, V, K]
    a_idx = semlink[:, :, 1, :]                                          # [B, V, K]
    valid_j = jnp.arange(K, dtype=jnp.int32)[None, None, :] < semlink_l[:, :, None]
    valid_v = jnp.arange(V, dtype=jnp.int32)[None, :] < v_l[:, None]
    valid = (valid_j & valid_v[:, :, None]).astype(f32)                  # [B, V, K]
    c_ids = jnp.arange(C, dtype=jnp.int32)[None, None, None, :]
    plus = ((c_ids == r_idx[..., None]) & (r_idx[..., None] != 0)).astype(f32)
    minus = ((c_ids == (a_idx[..., None] + C_srl)) & (a_idx[..., None] != 0)).astype(f32)
    oh = (plus - minus) * valid[..., None]                               # [B, V, K, C]

    grid_spec = pltpu.PrefetchScalarGridSpec(
        num_scalar_prefetch=1,                                           # only orig_l
        grid=(B,),
        in_specs=[
            pl.BlockSpec((None, V, C, T), lambda i, ol: (i, 0, 0, 0)),   # static index_map
            pl.BlockSpec((None, V, K, C), lambda i, ol: (i, 0, 0, 0)),
        ],
        out_specs=pl.BlockSpec((None, 1, 1), lambda i, ol: (i, 0, 0)),
    )

    partials = pl.pallas_call(
        _semlink_kernel,
        out_shape=jax.ShapeDtypeStruct((B, 1, 1), jnp.float32),
        grid_spec=grid_spec,
        compiler_params=pltpu.CompilerParams(
            dimension_semantics=("parallel",)),                          # megacore over B
    )(orig_l, log_cat_t, oh)

    loss = jnp.sum(partials)
    # opt.use_gold_predicate == 1  =>  normalizer = num_prop = sum(v_l)
    num_prop = jnp.sum(v_l).astype(jnp.float32)
    return loss / jnp.maximum(num_prop, 1.0)


def reference_loss(log_srl, log_vn, v_label, v_l, orig_l, semlink, semlink_l):
    """Pure numpy re-implementation of the PyTorch forward for validation."""
    log_srl = np.asarray(log_srl); log_vn = np.asarray(log_vn)
    v_label = np.asarray(v_label); v_l = np.asarray(v_l)
    orig_l = np.asarray(orig_l); semlink = np.asarray(semlink)
    semlink_l = np.asarray(semlink_l)
    B = log_srl.shape[0]
    K = semlink.shape[3]
    loss = 0.0
    num_prop = 0
    for i in range(B):
        num_prop += int(v_l[i])
        for k in range(int(v_l[i])):
            pos = int(v_label[i, k])
            for j in range(K):
                if j >= int(semlink_l[i, k]):
                    continue
                r_idx = int(semlink[i, k, 0, j])
                a_idx = int(semlink[i, k, 1, j])
                for t in range(int(orig_l[i])):
                    r = log_srl[i, pos, t, r_idx] if r_idx != 0 else 0.0
                    a = log_vn[i, pos, t, a_idx] if a_idx != 0 else 0.0
                    loss += abs(float(r) - float(a))
    return loss / max(num_prop, 1)


if __name__ == "__main__":
    B, SEQ, C_SRL, C_VN, V, K = 2, 16, 32, 32, 4, 8

    key = jax.random.PRNGKey(0)
    k1, k2, k3 = jax.random.split(key, 3)

    log_srl = jax.nn.log_softmax(
        jax.random.normal(k1, (B, SEQ, SEQ, C_SRL), jnp.float32), axis=-1)
    log_vn = jax.nn.log_softmax(
        jax.random.normal(k2, (B, SEQ, SEQ, C_VN), jnp.float32), axis=-1)

    v_l = jnp.array([3, 2], dtype=jnp.int32)                       # predicates per example
    orig_l = jnp.array([12, 10], dtype=jnp.int32)                  # valid seq lengths
    v_label = jnp.array([[2, 5, 9, 0],
                         [3, 7, 0, 0]], dtype=jnp.int32)           # predicate token positions
    semlink_l = jnp.array([[2, 0, 3, 0],
                           [1, 4, 0, 0]], dtype=jnp.int32)         # semlink lengths
    semlink = jax.random.randint(k3, (B, V, 2, K), 0,
                                 min(C_SRL, C_VN), dtype=jnp.int32)

    loss = jax.block_until_ready(
        semlink_loss(log_srl, log_vn, v_label, v_l, orig_l, semlink, semlink_l))

    ref = reference_loss(log_srl, log_vn, v_label, v_l, orig_l, semlink, semlink_l)
    np.testing.assert_allclose(float(loss), ref, rtol=1e-4, atol=1e-5)

    print("KERNEL_OK")
</pallas_src>

<mosaic_0001>
module attributes {stable_mosaic.version = 11 : i64} {
  func.func @_semlink_kernel(%arg0: i32, %arg1: memref<2xi32, #tpu.memory_space<smem>>, %arg2: memref<1x4x64x16xf32, #tpu.memory_space<vmem>>, %arg3: memref<1x4x8x64xf32, #tpu.memory_space<vmem>>, %arg4: memref<1x1x1xf32, #tpu.memory_space<vmem>>) attributes {dimension_semantics = [#tpu.dimension_semantics<parallel>], iteration_bounds = array<i64: 2>, scalar_prefetch = 1 : i64, scratch_operands = 0 : i64, tpu.core_type = #tpu.core_type<tc>, window_params = [{transform_indices = @transform_0, window_bounds = array<i64: 1, 4, 64, 16>}, {transform_indices = @transform_1, window_bounds = array<i64: 1, 4, 8, 64>}, {transform_indices = @transform_2, window_bounds = array<i64: 1, 1, 1>}]} {
    %c0 = arith.constant 0 : index
    %c0_0 = arith.constant 0 : index
    %c0_1 = arith.constant 0 : index
    %c0_2 = arith.constant 0 : index
    %0 = vector.load %arg2[%c0, %c0_0, %c0_1, %c0_2] : memref<1x4x64x16xf32, #tpu.memory_space<vmem>>, vector<1x4x64x16xf32>
    %1 = vector.shape_cast %0 : vector<1x4x64x16xf32> to vector<4x64x16xf32>
    %c0_3 = arith.constant 0 : index
    %c0_4 = arith.constant 0 : index
    %c0_5 = arith.constant 0 : index
    %c0_6 = arith.constant 0 : index
    %2 = vector.load %arg3[%c0_3, %c0_4, %c0_5, %c0_6] : memref<1x4x8x64xf32, #tpu.memory_space<vmem>>, vector<1x4x8x64xf32>
    %3 = vector.shape_cast %2 : vector<1x4x8x64xf32> to vector<4x8x64xf32>
    "tpu.trace_start"() <{level = 10 : i32, message = "vkc,vct->vkt"}> : () -> ()
    %cst = arith.constant dense<0.000000e+00> : vector<4x8x16xf32>
    %4 = tpu.matmul %3, %1, %cst {dimension_numbers = #tpu.dot_dimension_numbers<[2], [1], [1], [2], [0, 0, 0, 1, 1, 2], [0], [0]>, precision = #tpu.contract_precision<fp32>} : vector<4x8x64xf32>, vector<4x64x16xf32>, vector<4x8x16xf32> -> vector<4x8x16xf32>
    "tpu.trace_stop"() : () -> ()
    %5 = tpu.iota {dimensions = array<i32: 2>} : vector<1x1x16xi32>
    %6 = arith.index_cast %arg0 : i32 to index
    %7 = memref.load %arg1[%6] : memref<2xi32, #tpu.memory_space<smem>>
    %8 = vector.broadcast %7 : i32 to vector<1x1x16xi32>
    %9 = arith.cmpi slt, %5, %8 : vector<1x1x16xi32>
    %10 = math.absf %4 : vector<4x8x16xf32>
    %cst_7 = arith.constant 0.000000e+00 : f32
    %11 = vector.shape_cast %9 : vector<1x1x16xi1> to vector<1x1x16xi1>
    %12 = vector.broadcast %11 : vector<1x1x16xi1> to vector<4x8x16xi1>
    %13 = vector.broadcast %cst_7 : f32 to vector<4x8x16xf32>
    %14 = arith.select %12, %10, %13 : vector<4x8x16xi1>, vector<4x8x16xf32>
    %15 = vector.shape_cast %14 : vector<4x8x16xf32> to vector<1x4x8x16xf32>
    %cst_8 = arith.constant dense<0.000000e+00> : vector<1xf32>
    %16 = vector.multi_reduction <add>, %15, %cst_8 [1, 2, 3] : vector<1x4x8x16xf32> to vector<1xf32>
    %17 = vector.shape_cast %16 : vector<1xf32> to vector<1x1x1x1xf32>
    %18 = vector.extract %17[0, 0, 0, 0] : f32 from vector<1x1x1x1xf32>
    %19 = vector.broadcast %18 : f32 to vector<1x1xf32>
    %c0_9 = arith.constant 0 : index
    %c0_10 = arith.constant 0 : index
    %c0_11 = arith.constant 0 : index
    %20 = vector.load %arg4[%c0_9, %c0_10, %c0_11] : memref<1x1x1xf32, #tpu.memory_space<vmem>>, vector<1x1x1xf32>
    %21 = vector.shape_cast %20 : vector<1x1x1xf32> to vector<1x1xf32>
    %22 = vector.shape_cast %19 : vector<1x1xf32> to vector<1x1x1xf32>
    tpu.vector_store %arg4[%c0_9, %c0_10, %c0_11], %22 {strides = array<i32>} : memref<1x1x1xf32, #tpu.memory_space<vmem>>, vector<1x1x1xf32>,
    return
  }
  func.func @transform_0(%arg0: i32, %arg1: memref<2xi32, #tpu.memory_space<smem>>) -> (i32, i32, i32, i32) {
    %c0_i32 = arith.constant 0 : i32
    %c0_i32_0 = arith.constant 0 : i32
    %c0_i32_1 = arith.constant 0 : i32
    %c0_i32_2 = arith.constant 0 : i32
    return %arg0, %c0_i32, %c0_i32_0, %c0_i32_1 : i32, i32, i32, i32
  }
  func.func @transform_1(%arg0: i32, %arg1: memref<2xi32, #tpu.memory_space<smem>>) -> (i32, i32, i32, i32) {
    %c0_i32 = arith.constant 0 : i32
    %c0_i32_0 = arith.constant 0 : i32
    %c0_i32_1 = arith.constant 0 : i32
    %c0_i32_2 = arith.constant 0 : i32
    return %arg0, %c0_i32, %c0_i32_0, %c0_i32_1 : i32, i32, i32, i32
  }
  func.func @transform_2(%arg0: i32, %arg1: memref<2xi32, #tpu.memory_space<smem>>) -> (i32, i32, i32) {
    %c0_i32 = arith.constant 0 : i32
    %c0_i32_0 = arith.constant 0 : i32
    %c0_i32_1 = arith.constant 0 : i32
    return %arg0, %c0_i32, %c0_i32_0 : i32, i32, i32
  }
}

</mosaic_0001>

<bundles_post_ra>
// kernel: tpu_custom_call.1
= control target key start
LH: loop header
LB: loop body
LE: loop exit
PB: predicated region body
PF: predicated region fallthrough
CT: control target
= control target key end

     0   :  { %s4204_s0 = inlined_call_operand.vmem [shape: s32[2], index: 0, kind: input, shape index: {}]   ;;  %s4205_s1 = inlined_call_operand.vmem [shape: f32[2,4,64,16], index: 1, kind: input, shape index: {}]   ;;  %s4206_s2 = inlined_call_operand.vmem [shape: f32[2,4,8,64], index: 2, kind: input, shape index: {}]   ;;  %s4207_s3 = inlined_call_operand.vmem [shape: f32[2,1,1], index: 3, kind: output, shape index: {}]  }
   0x1   :  { %s8_s14 = sshll.u32 %s4204_s0, 4  ;;  %s9_s14 = int_to_ptr.vmem [resolvable:$true] %s8_s14 }
   0x2   :  { %s3485_s15 = scalar_lea.vmem %s9_s14, 16  ;;  %p3490_p1 = scmp.lt.s32.totalorder %s9_s14, %s9_s14 }
   0x3   :  { %p3486_p0 = scmp.ne.s32.totalorder %s9_s14, %s3485_s15  ;;  %p3491_p2 = scmp.lt.s32.totalorder %s3485_s15, %s3485_s15 }
   0x5   :  { %p3492_p3 = por %p3491_p2, %p3490_p1 }
   0x7   :  { %p3493_p4 = pnand %p3492_p3, %p3486_p0 }
   0x9   :  { %3496 = shalt.err (!%p3493_p4)  }
   0xa   :  { %s3507_s16 = smov [#allocation3]  }
   0xb   :  { %11 = dma.vmem_to_smem %s9_s14, 16, %s3507_s16, [#allocation2] }
   0xc   :  { %3501 = dma.done.wait [#allocation2], 16 }
   0xd   :  { %3502 = vsyncadd [#allocation2], 4294967280 }
   0xe   :  { %13 = sfence }
   0xf   :  { %s3534_s17 = smov 0  }
  0x10 LB: > { %s3540_s0 = sadd.s32 4294967295, %s3505_s17   ;;  %p2462_p5 = scmp.ge.s32.totalorder %s3505_s17, 1  ;;  %s3505_s17 = sphi %s3534_s17, %s19_s17  }
  0x11   : > { %p129_p6 = scmp.lt.s32.totalorder %s3505_s17, 3 }
  0x13   : > { %p130_p7 = pnand %p2462_p5, %p129_p6 }
  0x14   : > { %p154_p8 = scmp.lt.s32.totalorder (!%p130_p7), %s3540_s0, 1  ;;  %v3508_v0 = vmov (!%p130_p7), 0.0|0.0   ;;  %vm3509_vm0 = vmmov (!%p130_p7), 0   ;;  %v3510_v1 = vmov (!%p130_p7), 0.0   ;;  %vm203_vm1 = vcmask (!%p130_p7), 523264   ;;  %s2366_s27 = sld [smem:[#allocation3 + %s3540_s0]] (!%p130_p7) }
  0x15   : > { %133 = sbr.rel (%p130_p7) target bundleno = 656 (0x290), region = 28  ;;  %3143 = vmatprep.subr.bf16.mxu0 (!%p130_p7), %v3508_v0  ;;  %3215 = vmatprep.subr.bf16.mxu1 (!%p130_p7), %v3508_v0  ;;  %vm2379_vm3 = vcmask (!%p130_p7), 130048   ;;  %vm2397_vm4 = vcmask (!%p130_p7), 0  }
  0x16   : > { %2703 = vmatprep.mubr.msk.f32.mxu0 (!%p130_p7), %vm3509_vm0, %v3510_v1  ;;  %2817 = vmatprep.mubr.msk.f32.mxu1 (!%p130_p7), %vm3509_vm0, %v3510_v1 }
  0x1c   : > { %s3548_s18 = scalar_select %p154_p8, %s3540_s0, 1 }
  0x1e   : > { %s2469_s19 = sshll.u32 %s3548_s18, 8  ;;  %s2470_s23 = sshll.u32 %s3548_s18, 5 }
  0x1f   : > { %s3558_s22 = scalar_lea.vmem %s4205_s1, %s2469_s19  ;;  %s3593_s26 = scalar_lea.vmem %s4206_s2, %s2470_s23 }
  0x20   : > { %v167_v2 = vld [vmem:[%s3558_s22] sm:$0xff]  ;;  %v168_v3 = vld [vmem:[%s3558_s22 + $0x8] sm:$0xff]  ;;  %v169_v9 = vld [vmem:[%s3558_s22 + $0x10] sm:$0xff]  ;;  %s166_s30 = scalar_lea.vmem %s4207_s3, %s3548_s18 }
  0x21   : > { %v175_v4 = vld [vmem:[%s3558_s22 + $0x40] sm:$0xff]  ;;  %v208_v5 = vand.u32 4294901760, %v167_v2  ;;  %v211_v6 = vand.u32 4294901760, %v168_v3  ;;  %v176_v7 = vld [vmem:[%s3558_s22 + $0x48] sm:$0xff]  ;;  %v170_v10 = vld [vmem:[%s3558_s22 + $0x18] sm:$0xff]  ;;  %v214_v12 = vand.u32 4294901760, %v169_v9 }
  0x22   : > { %v748_v8 = vand.u32 4294901760, %v175_v4  ;;  %v751_v11 = vand.u32 4294901760, %v176_v7  ;;  %v217_v13 = vand.u32 4294901760, %v170_v10  ;;  %v177_v14 = vld [vmem:[%s3558_s22 + $0x50] sm:$0xff]  ;;  %v178_v15 = vld [vmem:[%s3558_s22 + $0x58] sm:$0xff]  ;;  %v171_v16 = vld [vmem:[%s3558_s22 + $0x20] sm:$0xff] }
  0x23   : > { %v3570_v17 = vpack.c.bf16 %v211_v6, %v208_v5  ;;  %v3572_v18 = vsub.f32 %v167_v2, %v208_v5  ;;  %v3574_v19 = vsub.f32 %v168_v3, %v211_v6  ;;  %v172_v21 = vld [vmem:[%s3558_s22 + $0x28] sm:$0xff]  ;;  %v179_v22 = vld [vmem:[%s3558_s22 + $0x60] sm:$0xff]  ;;  %v3587_v27 = vsub.f32 %v169_v9, %v214_v12  ;;  %v173_v28 = vld [vmem:[%s3558_s22 + $0x30] sm:$0xff] }
  0x24   : > { %v3576_v20 = vsub.f32 %v175_v4, %v748_v8  ;;  %v180_v23 = vld [vmem:[%s3558_s22 + $0x68] sm:$0xff]  ;;  %v3581_v24 = vpack.c.bf16 %v751_v11, %v748_v8  ;;  %v3583_v25 = vsub.f32 %v176_v7, %v751_v11  ;;  %v3585_v26 = vpack.c.bf16 %v217_v13, %v214_v12  ;;  %v174_v36 = vld [vmem:[%s3558_s22 + $0x38] sm:$0xff]  ;;  %v181_v38 = vld [vmem:[%s3558_s22 + $0x70] sm:$0xff] }
  0x25   : > { %3145 = vmatpush3.bf16.msra.mxu0 %v3570_v17  ;;  %v3596_v29 = vsub.f32 %v170_v10, %v217_v13  ;;  %v754_v30 = vand.u32 4294901760, %v177_v14  ;;  %v757_v31 = vand.u32 4294901760, %v178_v15  ;;  %v220_v32 = vand.u32 4294901760, %v171_v16  ;;  %v182_v43 = vld [vmem:[%s3558_s22 + $0x78] sm:$0xff]  ;;  %v199_v44 = vld [vmem:[%s3593_s26] sm:$0xff]  ;;  %v200_v57 = vld [vmem:[%s3593_s26 + $0x8] sm:$0xff] }
  0x26   : > { %3217 = vmatpush3.bf16.msra.mxu1 %v3581_v24  ;;  %3146 = vmatprep.subr.bf16.mxu0 %v3508_v0  ;;  %v223_v33 = vand.u32 4294901760, %v172_v21  ;;  %v760_v34 = vand.u32 4294901760, %v179_v22  ;;  %v763_v35 = vand.u32 4294901760, %v180_v23  ;;  %v226_v37 = vand.u32 4294901760, %v173_v28 }
  0x27   : > { %3218 = vmatprep.subr.bf16.mxu1 %v3508_v0  ;;  %v3603_v39 = vpack.c.bf16 %v757_v31, %v754_v30  ;;  %v3605_v40 = vsub.f32 %v177_v14, %v754_v30  ;;  %v3607_v41 = vsub.f32 %v178_v15, %v757_v31  ;;  %v3609_v42 = vsub.f32 %v171_v16, %v220_v32 }
  0x28   : > { %v3613_v45 = vpack.c.bf16 %v223_v33, %v220_v32  ;;  %v3615_v46 = vsub.f32 %v172_v21, %v223_v33  ;;  %v3617_v47 = vpack.c.bf16 %v763_v35, %v760_v34  ;;  %v3619_v48 = vsub.f32 %v179_v22, %v760_v34 }
  0x29   : > { %3148 = vmatpush3.bf16.msra.mxu0 %v3585_v26  ;;  %v3622_v49 = vsub.f32 %v180_v23, %v763_v35  ;;  %v229_v50 = vand.u32 4294901760, %v174_v36  ;;  %v3624_v51 = vsub.f32 %v173_v28, %v226_v37  ;;  %v766_v52 = vand.u32 4294901760, %v181_v38 }
  0x2a   : > { %3220 = vmatpush3.bf16.msra.mxu1 %v3603_v39  ;;  %3149 = vmatprep.subr.bf16.mxu0 %v3508_v0  ;;  %v769_v53 = vand.u32 4294901760, %v182_v43  ;;  %v205_v54 = vsel %vm203_vm1, %v199_v44, 0  ;;  %v293_v55 = vand.u32 4294901760, %v3572_v18  ;;  %v300_v56 = vand.u32 4294901760, %v3574_v19 }
  0x2b   : > { %3221 = vmatprep.subr.bf16.mxu1 %v3508_v0  ;;  %v3633_v58 = vpack.c.bf16 %v229_v50, %v226_v37  ;;  %v3635_v59 = vsub.f32 %v174_v36, %v229_v50  ;;  %v3637_v60 = vsub.f32 %v181_v38, %v766_v52  ;;  %v3639_v61 = vand.u32 4294901760, %v205_v54 }
  0x2c   : > { %v3641_v62 = vpack.c.bf16 %v769_v53, %v766_v52  ;;  %v3643_v63 = vsub.f32 %v182_v43, %v769_v53  ;;  %v294_v2 = vsub.f32 %v3572_v18, %v293_v55  ;;  %v301_v3 = vsub.f32 %v3574_v19, %v300_v56 }
  0x2d   : > { %3151 = vmatpush3.bf16.msra.mxu0 %v3613_v45  ;;  %v3653_v4 = vsub.f32 %v205_v54, %v3639_v61  ;;  %v745_v5 = vsel %vm203_vm1, %v200_v57, 0  ;;  %v833_v6 = vand.u32 4294901760, %v3576_v20  ;;  %v840_v7 = vand.u32 4294901760, %v3583_v25 }
  0x2e   : > { %3223 = vmatpush3.bf16.msra.mxu1 %v3617_v47  ;;  %3152 = vmatprep.subr.bf16.mxu0 %v3508_v0  ;;  %v295_v8 = vand.u32 4294901760, %v294_v2  ;;  %v302_v9 = vand.u32 4294901760, %v301_v3  ;;  %v3660_v10 = vand.u32 4294901760, %v745_v5  ;;  %v307_v11 = vand.u32 4294901760, %v3587_v27 }
  0x2f   : > { %3224 = vmatprep.subr.bf16.mxu1 %v3508_v0  ;;  %v282_v12 = vand.u32 4294901760, %v3653_v4  ;;  %v834_v13 = vsub.f32 %v3576_v20, %v833_v6  ;;  %v841_v14 = vsub.f32 %v3583_v25, %v840_v7  ;;  %v314_v15 = vand.u32 4294901760, %v3596_v29 }
  0x30   : > { %v3156_v16 = vpack.c.bf16 %v302_v9, %v295_v8  ;;  %v3673_v21 = vsub.f32 %v745_v5, %v3660_v10  ;;  %v308_v22 = vsub.f32 %v3587_v27, %v307_v11  ;;  %v847_v23 = vand.u32 4294901760, %v3605_v40 }
  0x31   : > { %3154 = vmatpush3.bf16.msra.mxu0 %v3633_v58  ;;  %v283_v28 = vsub.f32 %v3653_v4, %v282_v12  ;;  %v835_v30 = vand.u32 4294901760, %v834_v13  ;;  %v842_v31 = vand.u32 4294901760, %v841_v14  ;;  %v315_v32 = vsub.f32 %v3596_v29, %v314_v15 }
  0x32   : > { %3226 = vmatpush3.bf16.msra.mxu1 %v3641_v62  ;;  %3155 = vmatprep.subr.bf16.mxu0 %v3508_v0  ;;  %v822_v33 = vand.u32 4294901760, %v3673_v21  ;;  %v309_v34 = vand.u32 4294901760, %v308_v22  ;;  %v848_v35 = vsub.f32 %v3605_v40, %v847_v23  ;;  %v854_v36 = vand.u32 4294901760, %v3607_v41 }
  0x33   : > { %3227 = vmatprep.subr.bf16.mxu1 %v3508_v0  ;;  %v284_v37 = vand.u32 4294901760, %v283_v28  ;;  %v3228_v38 = vpack.c.bf16 %v842_v31, %v835_v30  ;;  %v316_v43 = vand.u32 4294901760, %v315_v32  ;;  %v321_v44 = vand.u32 4294901760, %v3609_v42 }
  0x34   : > { %v823_v50 = vsub.f32 %v3673_v21, %v822_v33  ;;  %v849_v52 = vand.u32 4294901760, %v848_v35  ;;  %v855_v53 = vsub.f32 %v3607_v41, %v854_v36  ;;  %v328_v54 = vand.u32 4294901760, %v3615_v46 }
  0x35   : > { %2704 = vmatmul.mubr.f32.vlgmr.msra.gmra.mrb[0].mxu0 %v284_v37  ;;  %v3159_v57 = vpack.c.bf16 %v316_v43, %v309_v34  ;;  %v322_v2 = vsub.f32 %v3609_v42, %v321_v44  ;;  %v861_v3 = vand.u32 4294901760, %v3619_v48  ;;  %v868_v5 = vand.u32 4294901760, %v3622_v49 }
  0x36   : > { %3157 = vmatpush3.bf16.msra.mxu0 %v3156_v16  ;;  %v824_v8 = vand.u32 4294901760, %v823_v50  ;;  %v856_v9 = vand.u32 4294901760, %v855_v53  ;;  %v329_v13 = vsub.f32 %v3615_v46, %v328_v54  ;;  %v335_v14 = vand.u32 4294901760, %v3624_v51  ;;  %2722 = vmatprep.mubr.msk.f32.mxu0 %vm3509_vm0, %v3510_v1 }
  0x37   : > { %3158 = vmatprep.subr.bf16.mxu0 %v3508_v0  ;;  %v323_v22 = vand.u32 4294901760, %v322_v2  ;;  %v862_v28 = vsub.f32 %v3619_v48, %v861_v3  ;;  %v869_v16 = vsub.f32 %v3622_v49, %v868_v5  ;;  %v342_v30 = vand.u32 4294901760, %v3635_v59 }
  0x38   : > { %2818 = vmatmul.mubr.f32.vlgmr.msra.gmra.mrb[0].mxu1 %v824_v8  ;;  %v3231_v31 = vpack.c.bf16 %v856_v9, %v849_v52  ;;  %v330_v32 = vand.u32 4294901760, %v329_v13  ;;  %v336_v34 = vsub.f32 %v3624_v51, %v335_v14  ;;  %v875_v35 = vand.u32 4294901760, %v3637_v60 }
  0x39   : > { %3229 = vmatpush3.bf16.msra.mxu1 %v3228_v38  ;;  %v863_v37 = vand.u32 4294901760, %v862_v28  ;;  %v870_v43 = vand.u32 4294901760, %v869_v16  ;;  %v343_v50 = vsub.f32 %v3635_v59, %v342_v30  ;;  %v882_v53 = vand.u32 4294901760, %v3643_v63  ;;  %2836 = vmatprep.mubr.msk.f32.mxu1 %vm3509_vm0, %v3510_v1 }
  0x3a   : > { %3230 = vmatprep.subr.bf16.mxu1 %v3508_v0  ;;  %3160 = vmatpush3.bf16.msra.mxu0 %v3159_v57  ;;  %v3162_v52 = vpack.c.bf16 %v330_v32, %v323_v22  ;;  %v337_v2 = vand.u32 4294901760, %v336_v34  ;;  %v876_v38 = vsub.f32 %v3637_v60, %v875_v35  ;;  %v3168_v32 = vpack.c.bf16 %v3574_v19, %v3572_v18 }
  0x3b   : > { %3161 = vmatprep.subr.bf16.mxu0 %v3508_v0  ;;  %v344_v8 = vand.u32 4294901760, %v343_v50  ;;  %v883_v9 = vsub.f32 %v3643_v63, %v882_v53  ;;  %v3234_v13 = vpack.c.bf16 %v870_v43, %v863_v37  ;;  %v3171_v34 = vpack.c.bf16 %v3596_v29, %v3587_v27  ;;  %v201_v37 = vld [vmem:[%s3593_s26 + $0x10] sm:$0xff]  ;;  %v202_v43 = vld [vmem:[%s3593_s26 + $0x18] sm:$0xff] }
  0x3c   : > { %v877_v28 = vand.u32 4294901760, %v876_v38  ;;  %v3243_v50 = vpack.c.bf16 %v3607_v41, %v3605_v40  ;;  %v3768_v38 = vsel %vm203_vm1, %v202_v43, 0  ;;  %v3195_v18 = vpack.c.bf16 %v314_v15, %v307_v11  ;;  %v183_v40 = vld [vmem:[%s3558_s22 + $0x80] sm:$0xff]  ;;  %v184_v41 = vld [vmem:[%s3558_s22 + $0x88] sm:$0xff] }
  0x3d   : > { %3232 = vmatpush3.bf16.msra.mxu1 %v3231_v31  ;;  %v884_v16 = vand.u32 4294901760, %v883_v9  ;;  %v3165_v57 = vpack.c.bf16 %v344_v8, %v337_v2  ;;  %v3240_v31 = vpack.c.bf16 %v3583_v25, %v3576_v20  ;;  %v3765_v2 = vsel %vm203_vm1, %v201_v37, 0  ;;  %v196_v15 = vld [vmem:[%s3558_s22 + $0xe8] sm:$0xff] }
  0x3e   : > { %3233 = vmatprep.subr.bf16.mxu1 %v3508_v0  ;;  %3163 = vmatpush3.bf16.msra.mxu0 %v3162_v52  ;;  %v3174_v52 = vpack.c.bf16 %v3615_v46, %v3609_v42  ;;  %v3246_v8 = vpack.c.bf16 %v3622_v49, %v3619_v48  ;;  %v3177_v9 = vpack.c.bf16 %v3635_v59, %v3624_v51  ;;  %v192_v42 = vld [vmem:[%s3558_s22 + $0xc8] sm:$0xff]  ;;  %v1288_v46 = vand.u32 4294901760, %v183_v40  ;;  %v186_v49 = vld [vmem:[%s3558_s22 + $0x98] sm:$0xff] }
  0x3f   : > { %3164 = vmatprep.subr.bf16.mxu0 %v3508_v0  ;;  %v3237_v22 = vpack.c.bf16 %v884_v16, %v877_v28  ;;  %v3192_v28 = vpack.c.bf16 %v300_v56, %v293_v55  ;;  %v3264_v16 = vpack.c.bf16 %v840_v7, %v833_v6  ;;  %v3267_v19 = vpack.c.bf16 %v854_v36, %v847_v23  ;;  %v193_v55 = vld [vmem:[%s3558_s22 + $0xd0] sm:$0xff]  ;;  %v194_v56 = vld [vmem:[%s3558_s22 + $0xd8] sm:$0xff] }
  0x40   : > { %v3198_v20 = vpack.c.bf16 %v328_v54, %v321_v44  ;;  %v3270_v25 = vpack.c.bf16 %v868_v5, %v861_v3  ;;  %v3201_v27 = vpack.c.bf16 %v342_v30, %v335_v14  ;;  %v3273_v29 = vpack.c.bf16 %v882_v53, %v875_v35  ;;  %v189_v5 = vld [vmem:[%s3558_s22 + $0xb0] sm:$0xff]  ;;  %v190_v14 = vld [vmem:[%s3558_s22 + $0xb8] sm:$0xff] }
  0x41   : > { %3235 = vmatpush3.bf16.msra.mxu1 %v3234_v13  ;;  %v3249_v13 = vpack.c.bf16 %v3643_v63, %v3637_v60  ;;  %v1291_v48 = vand.u32 4294901760, %v184_v41  ;;  %v1297_v60 = vand.u32 4294901760, %v186_v49  ;;  %v187_v63 = vld [vmem:[%s3558_s22 + $0xa0] sm:$0xff]  ;;  %v3880_v7 = vsub.f32 %v183_v40, %v1288_v46 }
  0x42   : > { %3236 = vmatprep.subr.bf16.mxu1 %v3508_v0  ;;  %3166 = vmatpush3.bf16.msra.mxu0 %v3165_v57  ;;  %v1837_v11 = vand.u32 4294901760, %v194_v56  ;;  %v3906_v30 = vand.u32 4294901760, %v3768_v38  ;;  %v1843_v57 = vand.u32 4294901760, %v196_v15 }
  0x43   : > { %3167 = vmatprep.subr.bf16.mxu0 %v3508_v0  ;;  %v3878_v6 = vpack.c.bf16 %v1291_v48, %v1288_v46 }
  0x44   : > { %v3925_v43 = vsub.f32 %v194_v56, %v1837_v11 }
  0x45   : > { %3238 = vmatpush3.bf16.msra.mxu1 %v3237_v22  ;;  %2723 = vmatmul.mubr.f32.vlgmr.msra.gmra.mrb[0].mxu0 %v3639_v61 }
  0x46   : > { %3239 = vmatprep.subr.bf16.mxu1 %v3508_v0  ;;  %3169 = vmatpush3.bf16.msra.mxu0 %v3168_v32  ;;  %v197_v32 = vld [vmem:[%s3558_s22 + $0xf0] sm:$0xff] }
  0x47   : > { %3170 = vmatprep.subr.bf16.mxu0 %v3508_v0  ;;  %2741 = vmatprep.mubr.msk.f32.mxu0 %vm3509_vm0, %v3510_v1 }
  0x48   : > { %2837 = vmatmul.mubr.f32.vlgmr.msra.gmra.mrb[0].mxu1 %v3660_v10 }
  0x49   : > { %3241 = vmatpush3.bf16.msra.mxu1 %v3240_v31  ;;  %2855 = vmatprep.mubr.msk.f32.mxu1 %vm3509_vm0, %v3510_v1 }
  0x4a   : > { %3242 = vmatprep.subr.bf16.mxu1 %v3508_v0  ;;  %3172 = vmatpush3.bf16.msra.mxu0 %v3171_v34  ;;  %v1373_v34 = vand.u32 4294901760, %v3880_v7 }
  0x4b   : > { %3173 = vmatprep.subr.bf16.mxu0 %v3508_v0 }
  0x4d   : > { %3244 = vmatpush3.bf16.msra.mxu1 %v3243_v50  ;;  %v1309_v50 = vand.u32 4294901760, %v190_v14 }
  0x4e   : > { %3245 = vmatprep.subr.bf16.mxu1 %v3508_v0  ;;  %3175 = vmatpush3.bf16.msra.mxu0 %v3174_v52 }
  0x4f   : > { %3176 = vmatprep.subr.bf16.mxu0 %v3508_v0 }
  0x51   : > { %3247 = vmatpush3.bf16.msra.mxu1 %v3246_v8  ;;  %v3937_v8 = vsub.f32 %v3768_v38, %v3906_v30 }
  0x52   : > { %3248 = vmatprep.subr.bf16.mxu1 %v3508_v0  ;;  %3178 = vmatpush3.bf16.msra.mxu0 %v3177_v9 }
  0x53   : > { %3179 = vmatprep.subr.bf16.mxu0 %v3508_v0 }
  0x55   : > { %3250 = vmatpush3.bf16.msra.mxu1 %v3249_v13  ;;  %2742 = vmatmul.mubr.f32.vlgmr.msra.gmra.mrb[0].mxu0 %v3653_v4  ;;  %v188_v4 = vld [vmem:[%s3558_s22 + $0xa8] sm:$0xff] }
  0x56   : > { %3251 = vmatprep.subr.bf16.mxu1 %v3508_v0  ;;  %3181 = vmatpush3.bf16.msra.mxu0 %v3570_v17  ;;  %v1303_v36 = vand.u32 4294901760, %v188_v4 }
  0x57   : > { %3182 = vmatprep.subr.bf16.mxu0 %v3508_v0  ;;  %2760 = vmatprep.mubr.msk.f32.mxu0 %vm3509_vm0, %v3510_v1 }
  0x58   : > { %2856 = vmatmul.mubr.f32.vlgmr.msra.gmra.mrb[0].mxu1 %v3673_v21  ;;  %v3888_v21 = vand.u32 4294901760, %v3765_v2 }
  0x59   : > { %3253 = vmatpush3.bf16.msra.mxu1 %v3581_v24  ;;  %2874 = vmatprep.mubr.msk.f32.mxu1 %vm3509_vm0, %v3510_v1 }
  0x5a   : > { %3254 = vmatprep.subr.bf16.mxu1 %v3508_v0  ;;  %3184 = vmatpush3.bf16.msra.mxu0 %v3585_v26  ;;  %v3919_v31 = vsub.f32 %v3765_v2, %v3888_v21  ;;  %v198_v2 = vld [vmem:[%s3558_s22 + $0xf8] sm:$0xff] }
  0x5b   : > { %3185 = vmatprep.subr.bf16.mxu0 %v3508_v0 }
  0x5c   : > { %v1362_v38 = vand.u32 4294901760, %v3919_v31 }
  0x5d   : > { %3256 = vmatpush3.bf16.msra.mxu1 %v3603_v39 }
  0x5e   : > { %3257 = vmatprep.subr.bf16.mxu1 %v3508_v0  ;;  %3187 = vmatpush3.bf16.msra.mxu0 %v3613_v45  ;;  %v1363_v56 = vsub.f32 %v3919_v31, %v1362_v38 }
  0x5f   : > { %3188 = vmatprep.subr.bf16.mxu0 %v3508_v0 }
  0x61   : > { %3259 = vmatpush3.bf16.msra.mxu1 %v3617_v47 }
  0x62   : > { %3260 = vmatprep.subr.bf16.mxu1 %v3508_v0  ;;  %3190 = vmatpush3.bf16.msra.mxu0 %v3633_v58 }
  0x63   : > { %3191 = vmatprep.subr.bf16.mxu0 %v3508_v0 }
  0x65   : > { %3262 = vmatpush3.bf16.msra.mxu1 %v3641_v62  ;;  %2761 = vmatmul.mubr.f32.vlgmr.msra.gmra.mrb[0].mxu0 %v282_v12  ;;  %v195_v12 = vld [vmem:[%s3558_s22 + $0xe0] sm:$0xff] }
  0x66   : > { %3263 = vmatprep.subr.bf16.mxu1 %v3508_v0  ;;  %3193 = vmatpush3.bf16.msra.mxu0 %v3192_v28  ;;  %v1840_v53 = vand.u32 4294901760, %v195_v12  ;;  %v3942_v28 = vsub.f32 %v188_v4, %v1303_v36 }
  0x67   : > { %3194 = vmatprep.subr.bf16.mxu0 %v3508_v0  ;;  %2779 = vmatprep.mubr.msk.f32.mxu0 %vm3509_vm0, %v3510_v1 }
  0x68   : > { %2875 = vmatmul.mubr.f32.vlgmr.msra.gmra.mrb[0].mxu1 %v822_v33 }
  0x69   : > { %3265 = vmatpush3.bf16.msra.mxu1 %v3264_v16  ;;  %2893 = vmatprep.mubr.msk.f32.mxu1 %vm3509_vm0, %v3510_v1  ;;  %v1846_v16 = vand.u32 4294901760, %v197_v32 }
  0x6a   : > { %3266 = vmatprep.subr.bf16.mxu1 %v3508_v0  ;;  %3196 = vmatpush3.bf16.msra.mxu0 %v3195_v18 }
  0x6b   : > { %3197 = vmatprep.subr.bf16.mxu0 %v3508_v0  ;;  %v3994_v4 = vsub.f32 %v197_v32, %v1846_v16  ;;  %v1364_v32 = vand.u32 4294901760, %v1363_v56 }
  0x6d   : > { %3268 = vmatpush3.bf16.msra.mxu1 %v3267_v19 }
  0x6e   : > { %3269 = vmatprep.subr.bf16.mxu1 %v3508_v0  ;;  %3199 = vmatpush3.bf16.msra.mxu0 %v3198_v20  ;;  %v3947_v20 = vpack.c.bf16 %v1843_v57, %v1840_v53 }
  0x6f   : > { %3200 = vmatprep.subr.bf16.mxu0 %v3508_v0 }
  0x71   : > { %3271 = vmatpush3.bf16.msra.mxu1 %v3270_v25 }
  0x72   : > { %3272 = vmatprep.subr.bf16.mxu1 %v3508_v0  ;;  %3202 = vmatpush3.bf16.msra.mxu0 %v3201_v27  ;;  %v3960_v27 = vsub.f32 %v195_v12, %v1840_v53 }
  0x73   : > { %3203 = vmatprep.subr.bf16.mxu0 %v3508_v0 }
  0x75   : > { %3274 = vmatpush3.bf16.msra.mxu1 %v3273_v29  ;;  %2780 = vmatmul.mubr.f32.vlgmr.msra.gmra.mrb[0].mxu0 %v3639_v61  ;;  %v3962_v29 = vsub.f32 %v196_v15, %v1843_v57 }
  0x76   : > { %3275 = vmatprep.subr.bf16.mxu1 %v3508_v0  ;;  %3205 = vmatpush3.bf16.msra.mxu0 %v3570_v17  ;;  %v191_v17 = vld [vmem:[%s3558_s22 + $0xc0] sm:$0xff] }
  0x77   : > { %3206 = vmatprep.subr.bf16.mxu0 %v3508_v0  ;;  %2798 = vmatprep.mubr.msk.f32.mxu0 %vm3509_vm0, %v3510_v1  ;;  %v1828_v51 = vand.u32 4294901760, %v191_v17 }
  0x78   : > { %2894 = vmatmul.mubr.f32.vlgmr.msra.gmra.mrb[0].mxu1 %v3660_v10 }
  0x79   : > { %3277 = vmatpush3.bf16.msra.mxu1 %v3581_v24  ;;  %2912 = vmatprep.mubr.msk.f32.mxu1 %vm3509_vm0, %v3510_v1  ;;  %v185_v24 = vld [vmem:[%s3558_s22 + $0x90] sm:$0xff]  ;;  %v3894_v33 = vsub.f32 %v191_v17, %v1828_v51 }
  0x7a   : > { %3278 = vmatprep.subr.bf16.mxu1 %v3508_v0  ;;  %3208 = vmatpush3.bf16.msra.mxu0 %v3585_v26  ;;  %v1831_v26 = vand.u32 4294901760, %v192_v42  ;;  %v1294_v59 = vand.u32 4294901760, %v185_v24 }
  0x7b   : > { %3209 = vmatprep.subr.bf16.mxu0 %v3508_v0  ;;  %v1913_v9 = vand.u32 4294901760, %v3894_v33 }
  0x7c   : > { %v3892_v23 = vpack.c.bf16 %v1831_v26, %v1828_v51  ;;  %v3897_v44 = vsub.f32 %v192_v42, %v1831_v26  ;;  %v3899_v54 = vpack.c.bf16 %v1297_v60, %v1294_v59  ;;  %v3901_v3 = vsub.f32 %v185_v24, %v1294_v59 }
  0x7d   : > { %3280 = vmatpush3.bf16.msra.mxu1 %v3603_v39  ;;  %v3883_v39 = vsub.f32 %v184_v41, %v1291_v48  ;;  %v1849_v41 = vand.u32 4294901760, %v198_v2  ;;  %v1902_v42 = vand.u32 4294901760, %v3937_v8  ;;  %v1914_v46 = vsub.f32 %v3894_v33, %v1913_v9 }
  0x7e   : > { %3281 = vmatprep.subr.bf16.mxu1 %v3508_v0  ;;  %3211 = vmatpush3.bf16.msra.mxu0 %v3613_v45  ;;  %v1834_v45 = vand.u32 4294901760, %v193_v55  ;;  %v1920_v13 = vand.u32 4294901760, %v3897_v44  ;;  %v1387_v18 = vand.u32 4294901760, %v3901_v3  ;;  %v1934_v26 = vand.u32 4294901760, %v3925_v43 }
  0x7f   : > { %3212 = vmatprep.subr.bf16.mxu0 %v3508_v0  ;;  %v1380_v37 = vand.u32 4294901760, %v3883_v39  ;;  %v3999_v12 = vsub.f32 %v198_v2, %v1849_v41  ;;  %v1903_v15 = vsub.f32 %v3937_v8, %v1902_v42  ;;  %v1948_v2 = vand.u32 4294901760, %v3962_v29 }
  0x80   : > { %v3910_v35 = vsub.f32 %v193_v55, %v1834_v45  ;;  %v3914_v22 = vpack.c.bf16 %v1837_v11, %v1834_v45  ;;  %v1921_v48 = vsub.f32 %v3897_v44, %v1920_v13  ;;  %v1388_v24 = vsub.f32 %v3901_v3, %v1387_v18 }
  0x81   : > { %3283 = vmatpush3.bf16.msra.mxu1 %v3617_v47  ;;  %v1300_v47 = vand.u32 4294901760, %v187_v63  ;;  %v1381_v25 = vsub.f32 %v3883_v39, %v1380_v37  ;;  %v3985_v55 = vsub.f32 %v190_v14, %v1309_v50  ;;  %v4208_v11 = vand.u32 4294901760, %v3942_v28 }
  0x82   : > { %3284 = vmatprep.subr.bf16.mxu1 %v3508_v0  ;;  %3214 = vmatpush3.bf16.msra.mxu0 %v3633_v58  ;;  %v3908_v58 = vsub.f32 %v186_v49, %v1297_v60  ;;  %v1927_v51 = vand.u32 4294901760, %v3910_v35  ;;  %v1935_v57 = vsub.f32 %v3925_v43, %v1934_v26 }
  0x83   : > { %3287 = vmatprep.subr.bf16.mxu0 %v3508_v0  ;;  %v3930_v52 = vsub.f32 %v187_v63, %v1300_v47  ;;  %v1382_v60 = vand.u32 4294901760, %v1381_v25  ;;  %v3992_v63 = vpack.c.bf16 %v1849_v41, %v1846_v16  ;;  %v1422_v41 = vand.u32 4294901760, %v3985_v55 }
  0x84   : > { %v1394_v19 = vand.u32 4294901760, %v3908_v58  ;;  %v1928_v53 = vsub.f32 %v3910_v35, %v1927_v51  ;;  %v1936_v56 = vand.u32 4294901760, %v1935_v57 }
  0x85   : > { %3286 = vmatpush3.bf16.msra.mxu1 %v3641_v62  ;;  %2799 = vmatmul.mubr.f32.vlgmr.msra.gmra.mrb[0].mxu0 %v3639_v61  ;;  %v3927_v62 = vpack.c.bf16 %v1303_v36, %v1300_v47  ;;  %v1306_v61 = vand.u32 4294901760, %v189_v5  ;;  %v4209_v45 = vand.u32 4294901760, %v3930_v52  ;;  %v1915_v47 = vand.u32 4294901760, %v1914_v46 }
  0x86   : > { %3359 = vmatprep.subr.bf16.mxu1 %v3508_v0  ;;  %3289 = vmatpush3.bf16.msra.mxu0 %v3878_v6  ;;  %v1395_v49 = vsub.f32 %v3908_v58, %v1394_v19  ;;  %v1922_v36 = vand.u32 4294901760, %v1921_v48  ;;  %v1904_v48 = vand.u32 4294901760, %v1903_v15 }
  0x87   : > { %3290 = vmatprep.subr.bf16.mxu0 %v3508_v0  ;;  %2931 = vmatprep.mubr.msk.f32.mxu0 %vm3509_vm0, %v3510_v1  ;;  %v3964_v40 = vpack.c.bf16 %v1309_v50, %v1306_v61  ;;  %v3967_v17 = vsub.f32 %v189_v5, %v1306_v61  ;;  %v1389_v5 = vand.u32 4294901760, %v1388_v24  ;;  %v1941_v50 = vand.u32 4294901760, %v3960_v27 }
  0x88   : > { %2913 = vmatmul.mubr.f32.vlgmr.msra.gmra.mrb[0].mxu1 %v3660_v10  ;;  %v1374_v10 = vsub.f32 %v3880_v7, %v1373_v34  ;;  %v1396_v14 = vand.u32 4294901760, %v1395_v49  ;;  %v1402_v16 = vsub.f32 %v3930_v52, %v4209_v45  ;;  %v3372_v46 = vpack.c.bf16 %v1922_v36, %v1915_v47 }
  0x89   : > { %3361 = vmatpush3.bf16.msra.mxu1 %v3892_v23  ;;  %3045 = vmatprep.mubr.msk.f32.mxu1 %vm3509_vm0, %v3510_v1  ;;  %v1415_v25 = vand.u32 4294901760, %v3967_v17  ;;  %v1929_v49 = vand.u32 4294901760, %v1928_v53  ;;  %v1962_v45 = vand.u32 4294901760, %v3999_v12 }
  0x8a   : > { %3362 = vmatprep.subr.bf16.mxu1 %v3508_v0  ;;  %3292 = vmatpush3.bf16.msra.mxu0 %v3899_v54  ;;  %v1375_v59 = vand.u32 4294901760, %v1374_v10  ;;  %v1409_v10 = vsub.f32 %v3942_v28, %v4208_v11  ;;  %v3303_v24 = vpack.c.bf16 %v1396_v14, %v1389_v5  ;;  %v1955_v11 = vand.u32 4294901760, %v3994_v4 }
  0x8b   : > { %3293 = vmatprep.subr.bf16.mxu0 %v3508_v0  ;;  %v1403_v15 = vand.u32 4294901760, %v1402_v16  ;;  %v1416_v36 = vsub.f32 %v3967_v17, %v1415_v25  ;;  %v1423_v5 = vsub.f32 %v3985_v55, %v1422_v41  ;;  %v3375_v14 = vpack.c.bf16 %v1936_v56, %v1929_v49 }
  0x8c   : > { %v3300_v61 = vpack.c.bf16 %v1382_v60, %v1375_v59  ;;  %v1942_v59 = vsub.f32 %v3960_v27, %v1941_v50  ;;  %v1949_v60 = vsub.f32 %v3962_v29, %v1948_v2  ;;  %v1410_v47 = vand.u32 4294901760, %v1409_v10 }
  0x8d   : > { %3364 = vmatpush3.bf16.msra.mxu1 %v3914_v22  ;;  %v1417_v10 = vand.u32 4294901760, %v1416_v36  ;;  %v3387_v36 = vpack.c.bf16 %v3925_v43, %v3910_v35  ;;  %v3345_v35 = vpack.c.bf16 %v1422_v41, %v1415_v25 }
  0x8e   : > { %3365 = vmatprep.subr.bf16.mxu1 %v3508_v0  ;;  %3295 = vmatpush3.bf16.msra.mxu0 %v3927_v62  ;;  %v1943_v53 = vand.u32 4294901760, %v1942_v59  ;;  %v1950_v57 = vand.u32 4294901760, %v1949_v60  ;;  %v3306_v16 = vpack.c.bf16 %v1410_v47, %v1403_v15  ;;  %v3384_v15 = vpack.c.bf16 %v3897_v44, %v3894_v33 }
  0x8f   : > { %3296 = vmatprep.subr.bf16.mxu0 %v3508_v0  ;;  %v3315_v47 = vpack.c.bf16 %v3908_v58, %v3901_v3  ;;  %v4210_v33 = vand.u32 4294901760, %v3930_v52  ;;  %v4211_v44 = vand.u32 4294901760, %v3942_v28  ;;  %v3414_v58 = vpack.c.bf16 %v1948_v2, %v1941_v50 }
  0x91   : > { %3367 = vmatpush3.bf16.msra.mxu1 %v3947_v20  ;;  %v3342_v3 = vpack.c.bf16 %v4211_v44, %v4210_v33 }
  0x92   : > { %3368 = vmatprep.subr.bf16.mxu1 %v3508_v0  ;;  %3298 = vmatpush3.bf16.msra.mxu0 %v3964_v40 }
  0x93   : > { %3299 = vmatprep.subr.bf16.mxu0 %v3508_v0 }
  0x95   : > { %3370 = vmatpush3.bf16.msra.mxu1 %v3992_v63  ;;  %2932 = vmatmul.mubr.f32.vlgmr.msra.gmra.mrb[2].mxu0 %v1364_v32  ;;  %v1956_v32 = vsub.f32 %v3994_v4, %v1955_v11 }
  0x96   : > { %3371 = vmatprep.subr.bf16.mxu1 %v3508_v0  ;;  %3301 = vmatpush3.bf16.msra.mxu0 %v3300_v61  ;;  %v1963_v61 = vsub.f32 %v3999_v12, %v1962_v45 }
  0x97   : > { %3302 = vmatprep.subr.bf16.mxu0 %v3508_v0  ;;  %2950 = vmatprep.mubr.msk.f32.mxu0 %vm3509_vm0, %v3510_v1  ;;  %v1957_v49 = vand.u32 4294901760, %v1956_v32  ;;  %v3336_v32 = vpack.c.bf16 %v1380_v37, %v1373_v34 }
  0x98   : > { %3046 = vmatmul.mubr.f32.vlgmr.msra.gmra.mrb[2].mxu1 %v1904_v48  ;;  %v1424_v48 = vand.u32 4294901760, %v1423_v5  ;;  %v1964_v56 = vand.u32 4294901760, %v1963_v61  ;;  %v3318_v5 = vpack.c.bf16 %v3942_v28, %v3930_v52  ;;  %v3408_v61 = vpack.c.bf16 %v1920_v13, %v1913_v9 }
  0x99   : > { %3373 = vmatpush3.bf16.msra.mxu1 %v3372_v46  ;;  %3064 = vmatprep.mubr.msk.f32.mxu1 %vm3509_vm0, %v3510_v1  ;;  %v3378_v46 = vpack.c.bf16 %v1950_v57, %v1943_v53  ;;  %v3321_v53 = vpack.c.bf16 %v3985_v55, %v3967_v17  ;;  %v3393_v57 = vpack.c.bf16 %v3999_v12, %v3994_v4 }
  0x9a   : > { %3374 = vmatprep.subr.bf16.mxu1 %v3508_v0  ;;  %3304 = vmatpush3.bf16.msra.mxu0 %v3303_v24  ;;  %v3309_v59 = vpack.c.bf16 %v1424_v48, %v1417_v10  ;;  %v3381_v60 = vpack.c.bf16 %v1964_v56, %v1957_v49  ;;  %v3312_v24 = vpack.c.bf16 %v3883_v39, %v3880_v7 }
  0x9b   : > { %3305 = vmatprep.subr.bf16.mxu0 %v3508_v0  ;;  %v3339_v7 = vpack.c.bf16 %v1394_v19, %v1387_v18  ;;  %v3411_v39 = vpack.c.bf16 %v1934_v26, %v1927_v51 }
  0x9d   : > { %3376 = vmatpush3.bf16.msra.mxu1 %v3375_v14  ;;  %v3390_v14 = vpack.c.bf16 %v3962_v29, %v3960_v27 }
  0x9e   : > { %3377 = vmatprep.subr.bf16.mxu1 %v3508_v0  ;;  %3307 = vmatpush3.bf16.msra.mxu0 %v3306_v16 }
  0x9f   : > { %3308 = vmatprep.subr.bf16.mxu0 %v3508_v0 }
  0xa1   : > { %3379 = vmatpush3.bf16.msra.mxu1 %v3378_v46 }
  0xa2   : > { %3380 = vmatprep.subr.bf16.mxu1 %v3508_v0  ;;  %3310 = vmatpush3.bf16.msra.mxu0 %v3309_v59 }
  0xa3   : > { %3311 = vmatprep.subr.bf16.mxu0 %v3508_v0 }
  0xa5   : > { %3382 = vmatpush3.bf16.msra.mxu1 %v3381_v60  ;;  %2951 = vmatmul.mubr.f32.vlgmr.msra.gmra.mrb[2].mxu0 %v3888_v21 }
  0xa6   : > { %3383 = vmatprep.subr.bf16.mxu1 %v3508_v0  ;;  %3313 = vmatpush3.bf16.msra.mxu0 %v3312_v24 }
  0xa7   : > { %3314 = vmatprep.subr.bf16.mxu0 %v3508_v0  ;;  %2969 = vmatprep.mubr.msk.f32.mxu0 %vm3509_vm0, %v3510_v1 }
  0xa8   : > { %3065 = vmatmul.mubr.f32.vlgmr.msra.gmra.mrb[2].mxu1 %v3906_v30 }
  0xa9   : > { %3385 = vmatpush3.bf16.msra.mxu1 %v3384_v15  ;;  %3083 = vmatprep.mubr.msk.f32.mxu1 %vm3509_vm0, %v3510_v1 }
  0xaa   : > { %3386 = vmatprep.subr.bf16.mxu1 %v3508_v0  ;;  %3316 = vmatpush3.bf16.msra.mxu0 %v3315_v47 }
  0xab   : > { %3317 = vmatprep.subr.bf16.mxu0 %v3508_v0 }
  0xad   : > { %3388 = vmatpush3.bf16.msra.mxu1 %v3387_v36 }
  0xae   : > { %3389 = vmatprep.subr.bf16.mxu1 %v3508_v0  ;;  %3319 = vmatpush3.bf16.msra.mxu0 %v3318_v5 }
  0xaf   : > { %3320 = vmatprep.subr.bf16.mxu0 %v3508_v0 }
  0xb1   : > { %3391 = vmatpush3.bf16.msra.mxu1 %v3390_v14 }
  0xb2   : > { %3392 = vmatprep.subr.bf16.mxu1 %v3508_v0  ;;  %3322 = vmatpush3.bf16.msra.mxu0 %v3321_v53 }
  0xb3   : > { %3323 = vmatprep.subr.bf16.mxu0 %v3508_v0 }
  0xb5   : > { %3394 = vmatpush3.bf16.msra.mxu1 %v3393_v57  ;;  %2970 = vmatmul.mubr.f32.vlgmr.msra.gmra.mrb[2].mxu0 %v3919_v31  ;;  %v3417_v31 = vpack.c.bf16 %v1962_v45, %v1955_v11 }
  0xb6   : > { %3395 = vmatprep.subr.bf16.mxu1 %v3508_v0  ;;  %3325 = vmatpush3.bf16.msra.mxu0 %v3878_v6 }
  0xb7   : > { %3326 = vmatprep.subr.bf16.mxu0 %v3508_v0  ;;  %2988 = vmatprep.mubr.msk.f32.mxu0 %vm3509_vm0, %v3510_v1 }
  0xb8   : > { %3084 = vmatmul.mubr.f32.vlgmr.msra.gmra.mrb[2].mxu1 %v3937_v8 }
  0xb9   : > { %3397 = vmatpush3.bf16.msra.mxu1 %v3892_v23  ;;  %3102 = vmatprep.mubr.msk.f32.mxu1 %vm3509_vm0, %v3510_v1 }
  0xba   : > { %3398 = vmatprep.subr.bf16.mxu1 %v3508_v0  ;;  %3328 = vmatpush3.bf16.msra.mxu0 %v3899_v54 }
  0xbb   : > { %3329 = vmatprep.subr.bf16.mxu0 %v3508_v0 }
  0xbd   : > { %3400 = vmatpush3.bf16.msra.mxu1 %v3914_v22 }
  0xbe   : > { %3401 = vmatprep.subr.bf16.mxu1 %v3508_v0  ;;  %3331 = vmatpush3.bf16.msra.mxu0 %v3927_v62 }
  0xbf   : > { %3332 = vmatprep.subr.bf16.mxu0 %v3508_v0 }
  0xc1   : > { %3403 = vmatpush3.bf16.msra.mxu1 %v3947_v20 }
  0xc2   : > { %3404 = vmatprep.subr.bf16.mxu1 %v3508_v0  ;;  %3334 = vmatpush3.bf16.msra.mxu0 %v3964_v40 }
  0xc3   : > { %3335 = vmatprep.subr.bf16.mxu0 %v3508_v0 }
  0xc5   : > { %3406 = vmatpush3.bf16.msra.mxu1 %v3992_v63  ;;  %2989 = vmatmul.mubr.f32.vlgmr.msra.gmra.mrb[2].mxu0 %v1362_v38 }
  0xc6   : > { %3407 = vmatprep.subr.bf16.mxu1 %v3508_v0  ;;  %3337 = vmatpush3.bf16.msra.mxu0 %v3336_v32 }
  0xc7   : > { %3338 = vmatprep.subr.bf16.mxu0 %v3508_v0  ;;  %3007 = vmatprep.mubr.msk.f32.mxu0 %vm3509_vm0, %v3510_v1 }
  0xc8   : > { %3103 = vmatmul.mubr.f32.vlgmr.msra.gmra.mrb[2].mxu1 %v1902_v42 }
  0xc9   : > { %3409 = vmatpush3.bf16.msra.mxu1 %v3408_v61  ;;  %3121 = vmatprep.mubr.msk.f32.mxu1 %vm3509_vm0, %v3510_v1 }
  0xca   : > { %3410 = vmatprep.subr.bf16.mxu1 %v3508_v0  ;;  %3340 = vmatpush3.bf16.msra.mxu0 %v3339_v7 }
  0xcb   : > { %3341 = vmatprep.subr.bf16.mxu0 %v3508_v0 }
  0xcd   : > { %3412 = vmatpush3.bf16.msra.mxu1 %v3411_v39 }
  0xce   : > { %3413 = vmatprep.subr.bf16.mxu1 %v3508_v0  ;;  %3343 = vmatpush3.bf16.msra.mxu0 %v3342_v3 }
  0xcf   : > { %3344 = vmatprep.subr.bf16.mxu0 %v3508_v0 }
  0xd1   : > { %3415 = vmatpush3.bf16.msra.mxu1 %v3414_v58 }
  0xd2   : > { %3416 = vmatprep.subr.bf16.mxu1 %v3508_v0  ;;  %3346 = vmatpush3.bf16.msra.mxu0 %v3345_v35 }
  0xd3   : > { %3347 = vmatprep.subr.bf16.mxu0 %v3508_v0 }
  0xd5   : > { %3418 = vmatpush3.bf16.msra.mxu1 %v3417_v31  ;;  %3008 = vmatmul.mubr.f32.vlgmr.msra.gmra.mrb[2].mxu0 %v3888_v21 }
  0xd6   : > { %3419 = vmatprep.subr.bf16.mxu1 %v3508_v0  ;;  %3349 = vmatpush3.bf16.msra.mxu0 %v3878_v6 }
  0xd7   : > { %3350 = vmatprep.subr.bf16.mxu0 %v3508_v0  ;;  %3026 = vmatprep.mubr.msk.f32.mxu0 %vm3509_vm0, %v3510_v1 }
  0xd8   : > { %3122 = vmatmul.mubr.f32.vlgmr.msra.gmra.mrb[2].mxu1 %v3906_v30 }
  0xd9   : > { %3421 = vmatpush3.bf16.msra.mxu1 %v3892_v23  ;;  %3140 = vmatprep.mubr.msk.f32.mxu1 %vm3509_vm0, %v3510_v1  ;;  %v2364_v1 = vlaneseq  ;;  %v2367_v23 = vstv %s2366_s27 }
  0xda   : > { %3422 = vmatprep.subr.bf16.mxu1 %v3508_v0  ;;  %3352 = vmatpush3.bf16.msra.mxu0 %v3899_v54 }
  0xdb   : > { %3353 = vmatprep.subr.bf16.mxu0 %v3508_v0  ;;  %v2365_v6 = vand.u32 127, %v2364_v1 }
  0xdd   : > { %3424 = vmatpush3.bf16.msra.mxu1 %v3914_v22  ;;  %vm4181_vm2 = vcmp.lt.s32.totalorder %v2365_v6, %v2367_v23 }
  0xde   : > { %3425 = vmatprep.subr.bf16.mxu1 %v3508_v0  ;;  %3355 = vmatpush3.bf16.msra.mxu0 %v3927_v62 }
  0xdf   : > { %3356 = vmatprep.subr.bf16.mxu0 %v3508_v0 }
  0xe1   : > { %3427 = vmatpush3.bf16.msra.mxu1 %v3947_v20 }
  0xe2   : > { %3428 = vmatprep.subr.bf16.mxu1 %v3508_v0  ;;  %3358 = vmatpush3.bf16.msra.mxu0 %v3964_v40 }
  0xe5   : > { %3430 = vmatpush3.bf16.msra.mxu1 %v3992_v63  ;;  %3027 = vmatmul.mubr.f32.vlgmr.msra.gmra.mrb[2].mxu0 %v3888_v21 }
  0xe8   : > { %3141 = vmatmul.mubr.f32.vlgmr.msra.gmra.mrb[2].mxu1 %v3906_v30 }
 0x158   : > { %v740_v54 = vpop.f32.mrb[0].mxu0 }
 0x159   : > { %v2369_v34 = vand.u32 2147483647, %v740_v54  ;;  %v2800_v37 = vpop.f32.mrb[1].mxu0 }
 0x15b   : > { %v2375_v0 = vsel %vm4181_vm2, %v2369_v34, 0.0  ;;  %v1280_v43 = vpop.f32.mrb[0].mxu1 }
 0x15c   : > { %v2370_v62 = vand.u32 2147483647, %v1280_v43  ;;  %v2914_v21 = vpop.f32.mrb[1].mxu1  ;;  %v2380_v30 = vsel %vm2379_vm3, %v2375_v0, 0.0 }
 0x15e   : > { %v2376_v52 = vsel %vm4181_vm2, %v2370_v62, 0.0 }
 0x15f   : > { %v2381_v8 = vsel %vm2379_vm3, %v2376_v52, 0.0 }
 0x160   : > { %v2382_v9 = vadd.f32 %v2381_v8, %v2380_v30 }
 0x1b8   : > { %v1820_v13 = vpop.f32.mrb[2].mxu0 }
 0x1b9   : > { %v2371_v28 = vand.u32 2147483647, %v1820_v13  ;;  %v3028_v18 = vpop.f32.mrb[3].mxu0 }
 0x1bb   : > { %v2377_v19 = vsel %vm4181_vm2, %v2371_v28, 0.0  ;;  %v2360_v20 = vpop.f32.mrb[2].mxu1 }
 0x1bc   : > { %v2372_v38 = vand.u32 2147483647, %v2360_v20  ;;  %v3142_v27 = vpop.f32.mrb[3].mxu1  ;;  %v2383_v29 = vsel %vm2379_vm3, %v2377_v19, 0.0 }
 0x1bd   : > { %v2384_v40 = vadd.f32 %v2383_v29, %v2382_v9 }
 0x1be   : > { %v2378_v17 = vsel %vm4181_vm2, %v2372_v38, 0.0 }
 0x1bf   : > { %v2385_v42 = vsel %vm2379_vm3, %v2378_v17, 0.0 }
 0x1c0   : > { %v2386_v51 = vadd.f32 %v2385_v42, %v2384_v40 }
 0x1c2   : > { %2387 = vadd.xlane.f32.xlu0 %v2386_v51 }
 0x24f   : > { %v2388_v26 = vpop.xlane.xlu0 %2387 }
 0x250   : > { %v2389_v55 = vrot.slane %v2388_v26, 4 }
 0x252   : > { %v2390_v63 = vadd.f32 %v2389_v55, %v2388_v26 }
 0x254   : > { %v2391_v4 = vrot.slane %v2390_v63, 2 }
 0x256   : > { %v2392_v45 = vadd.f32 %v2391_v4, %v2390_v63 }
 0x258   : > { %v2393_v11 = vrot.slane %v2392_v45, 1 }
 0x25a   : > { %v2394_v12 = vadd.f32 %v2393_v11, %v2392_v45 }
 0x25c   : > { %3471 = vpush %v2394_v12 }
 0x28d   : > { %s3472_s4 = spop %3471 }
 0x28e   : > { %v2396_v50 = vstv %s3472_s4 }
 0x28f   : > { %2398 = vst.msk [vmem:[%s166_s30] sm:$0x1] %vm2397_vm4, %v2396_v50 }
 0x290 PF: > { %s19_s17 = sadd.s32 1, %s3505_s17  }
 0x291   : > { %p16_p9 = scmp.ge.s32.totalorder %s19_s17, 4  }
 0x293   :  { %18 = sbr.rel (!%p16_p9) target bundleno = 16 (0x10), region = 61 }

</bundles_post_ra>
